<compile_context>
chip_gen: v7x
topology: tpu7x:2x2x1
jax: 0.10.0
libtpu: 0.0.40
codegen_flags: <defaults>
</compile_context>

<pallas_src>
import jax
import jax.numpy as jnp
from jax.experimental import pallas as pl
from jax.experimental.pallas import tpu as pltpu

LN_EPS = 1e-5  # PyTorch nn.LayerNorm default


def _round_up(x, m):
    return (x + m - 1) // m * m


def layernorm_kernel(x_ref, gamma_ref, beta_ref, o_ref):
    """LayerNorm over the last axis of a (B, F) block. f32 math, o_ref dtype out."""
    x = x_ref[...].astype(jnp.float32)                       # (B, F)
    mean = jnp.mean(x, axis=-1, keepdims=True)               # (B, 1)
    xc = x - mean
    var = jnp.mean(xc * xc, axis=-1, keepdims=True)          # biased var (PyTorch LN)
    inv = jax.lax.rsqrt(var + LN_EPS)
    xn = xc * inv * gamma_ref[...].astype(jnp.float32) + beta_ref[...].astype(jnp.float32)
    o_ref[...] = xn.astype(o_ref.dtype)


def projection_kernel(xn_ref, w_ref, bias_ref, o_ref, acc_ref):
    """One (tile_f, tile_o) step of  out = xn @ W + b  with f32 accumulation."""
    k = pl.program_id(1)

    @pl.when(k == 0)
    def _():
        acc_ref[...] = jnp.zeros_like(acc_ref)

    # bf16 x bf16 -> f32 on the MXU (no in-kernel weight upcast).
    acc_ref[...] += jnp.dot(xn_ref[...], w_ref[...],
                            preferred_element_type=jnp.float32)

    @pl.when(k == pl.num_programs(1) - 1)
    def _():
        o_ref[...] = (acc_ref[...] + bias_ref[...].astype(jnp.float32)).astype(o_ref.dtype)


def mlp_head(x, gamma, beta, w_t, bias, *, tile_o=512, tile_f=2048,
             compute_dtype=jnp.bfloat16):
    """x: (B, N, D); gamma/beta: (F,); w_t: (F, O) transposed Linear weight; bias: (O,)."""
    B, N, D = x.shape
    F = N * D
    O = w_t.shape[1]
    assert w_t.shape[0] == F and gamma.shape == (F,) and beta.shape == (F,) and bias.shape == (O,)

    xf = x.reshape(B, F)  # rearrange 'b n d -> b (n d)'

    # --- 1) LayerNorm over the full flattened feature axis (single VMEM block). ---
    xn = pl.pallas_call(
        layernorm_kernel,
        out_shape=jax.ShapeDtypeStruct((B, F), compute_dtype),
    )(xf, gamma.reshape(1, F), beta.reshape(1, F))

    # --- 2) Tiled, K-accumulated projection on the MXU. ---
    tile_f = min(tile_f, _round_up(F, 128))
    tile_o = min(tile_o, _round_up(O, 128))
    F_pad = _round_up(F, tile_f)
    O_pad = _round_up(O, tile_o)

    if F_pad != F:
        xn = jnp.pad(xn, ((0, 0), (0, F_pad - F)))
    w_p = w_t.astype(compute_dtype)
    if F_pad != F or O_pad != O:
        w_p = jnp.pad(w_p, ((0, F_pad - F), (0, O_pad - O)))
    bias_p = bias.astype(jnp.float32)
    if O_pad != O:
        bias_p = jnp.pad(bias_p, (0, O_pad - O))

    grid = (O_pad // tile_o, F_pad // tile_f)  # reduction (F) axis last

    out = pl.pallas_call(
        projection_kernel,
        out_shape=jax.ShapeDtypeStruct((B, O_pad), x.dtype),
        grid_spec=pltpu.PrefetchScalarGridSpec(
            num_scalar_prefetch=0,
            grid=grid,
            in_specs=[
                pl.BlockSpec((B, tile_f), lambda j, k: (0, k)),      # xn slice (bf16)
                pl.BlockSpec((tile_f, tile_o), lambda j, k: (k, j)),  # weight tile (bf16)
                pl.BlockSpec((1, tile_o), lambda j, k: (0, j)),      # bias tile (f32)
            ],
            out_specs=pl.BlockSpec((B, tile_o), lambda j, k: (0, j)),
            scratch_shapes=[pltpu.VMEM((B, tile_o), jnp.float32)],   # f32 accumulator
        ),
        compiler_params=pltpu.CompilerParams(
            dimension_semantics=("parallel", "arbitrary")),
    )(xn, w_p, bias_p.reshape(1, O_pad))

    return out[:, :O] if O_pad != O else out


if __name__ == "__main__":
    # Small shapes consistent with the module's forward (full model: N=197, D=256,
    # F=50432, O=38612).  Chosen so the grid has multiple tiles along both axes
    # and exercises the F- and O-padding paths: F=384 (tile_f=256 -> F_pad=512),
    # O=300 (tile_o=128 -> O_pad=384).
    B, N, D = 2, 8, 48
    F = N * D
    O = 300

    key = jax.random.PRNGKey(0)
    kx, kg, kb, kw, kbias = jax.random.split(key, 5)

    x = jax.random.normal(kx, (B, N, D), dtype=jnp.float32)
    gamma = 1.0 + 0.01 * jax.random.normal(kg, (F,), dtype=jnp.float32)
    beta = 0.01 * jax.random.normal(kb, (F,), dtype=jnp.float32)
    w_f32 = jax.random.normal(kw, (F, O), dtype=jnp.float32) / jnp.sqrt(F)
    w_bf16 = w_f32.astype(jnp.bfloat16)          # weights stored / streamed in bf16
    bias = 0.01 * jax.random.normal(kbias, (O,), dtype=jnp.float32)

    out = mlp_head(x, gamma, beta, w_bf16, bias, tile_o=128, tile_f=256)
    out = jax.block_until_ready(out)

    # Pure-JAX reference (f32 LN; bf16 weights upcast so only activation
    # quantization separates it from the kernel).
    xf = x.reshape(B, F)
    mean = jnp.mean(xf, axis=-1, keepdims=True)
    var = jnp.mean((xf - mean) ** 2, axis=-1, keepdims=True)
    xn_ref = (xf - mean) * jax.lax.rsqrt(var + LN_EPS) * gamma + beta
    ref = xn_ref @ w_bf16.astype(jnp.float32) + bias

    assert out.shape == (B, O)
    assert out.dtype == x.dtype
    assert jnp.allclose(out, ref, atol=5e-2, rtol=5e-2), "mismatch vs reference"

    print("KERNEL_OK")
</pallas_src>

<mosaic_0001>
module attributes {stable_mosaic.version = 11 : i64} {
  func.func @layernorm_kernel(%arg0: memref<2x384xf32, #tpu.memory_space<vmem>>, %arg1: memref<1x384xf32, #tpu.memory_space<vmem>>, %arg2: memref<1x384xf32, #tpu.memory_space<vmem>>, %arg3: memref<2x384xbf16, #tpu.memory_space<vmem>>) attributes {dimension_semantics = [], scalar_prefetch = 0 : i64, scratch_operands = 0 : i64, tpu.core_type = #tpu.core_type<tc>} {
    %c0 = arith.constant 0 : index
    %c0_0 = arith.constant 0 : index
    %0 = vector.load %arg0[%c0, %c0_0] : memref<2x384xf32, #tpu.memory_space<vmem>>, vector<2x384xf32>
    %cst = arith.constant dense<0.000000e+00> : vector<2xf32>
    %1 = vector.multi_reduction <add>, %0, %cst [1] : vector<2x384xf32> to vector<2xf32>
    %2 = vector.shape_cast %1 : vector<2xf32> to vector<2x1xf32>
    %cst_1 = arith.constant 3.840000e+02 : f32
    %3 = vector.broadcast %cst_1 : f32 to vector<2x1xf32>
    %4 = arith.divf %2, %3 : vector<2x1xf32>
    %5 = vector.broadcast %4 : vector<2x1xf32> to vector<2x384xf32>
    %6 = arith.subf %0, %5 : vector<2x384xf32>
    %7 = arith.mulf %6, %6 : vector<2x384xf32>
    %cst_2 = arith.constant dense<0.000000e+00> : vector<2xf32>
    %8 = vector.multi_reduction <add>, %7, %cst_2 [1] : vector<2x384xf32> to vector<2xf32>
    %9 = vector.shape_cast %8 : vector<2xf32> to vector<2x1xf32>
    %cst_3 = arith.constant 3.840000e+02 : f32
    %10 = vector.broadcast %cst_3 : f32 to vector<2x1xf32>
    %11 = arith.divf %9, %10 : vector<2x1xf32>
    %cst_4 = arith.constant 9.99999974E-6 : f32
    %12 = vector.broadcast %cst_4 : f32 to vector<2x1xf32>
    %13 = arith.addf %11, %12 : vector<2x1xf32>
    %14 = math.rsqrt %13 : vector<2x1xf32>
    %15 = vector.broadcast %14 : vector<2x1xf32> to vector<2x384xf32>
    %16 = arith.mulf %6, %15 : vector<2x384xf32>
    %c0_5 = arith.constant 0 : index
    %c0_6 = arith.constant 0 : index
    %17 = vector.load %arg1[%c0_5, %c0_6] : memref<1x384xf32, #tpu.memory_space<vmem>>, vector<1x384xf32>
    %18 = vector.broadcast %17 : vector<1x384xf32> to vector<2x384xf32>
    %19 = arith.mulf %16, %18 : vector<2x384xf32>
    %c0_7 = arith.constant 0 : index
    %c0_8 = arith.constant 0 : index
    %20 = vector.load %arg2[%c0_7, %c0_8] : memref<1x384xf32, #tpu.memory_space<vmem>>, vector<1x384xf32>
    %21 = vector.broadcast %20 : vector<1x384xf32> to vector<2x384xf32>
    %22 = arith.addf %19, %21 : vector<2x384xf32>
    %23 = arith.truncf %22 : vector<2x384xf32> to vector<2x384xbf16>
    %c0_9 = arith.constant 0 : index
    %c0_10 = arith.constant 0 : index
    %24 = vector.load %arg3[%c0_9, %c0_10] : memref<2x384xbf16, #tpu.memory_space<vmem>>, vector<2x384xbf16>
    tpu.vector_store %arg3[%c0_9, %c0_10], %23 {strides = array<i32>} : memref<2x384xbf16, #tpu.memory_space<vmem>>, vector<2x384xbf16>,
    return
  }
}

</mosaic_0001>

<bundles_post_ra>
// kernel: tpu_custom_call.1
= control target key start
LH: loop header
LB: loop body
LE: loop exit
PB: predicated region body
PF: predicated region fallthrough
CT: control target
= control target key end

     0   :  { %8 = vsyncpa [#allocation3], 0  ;;  %s378_s0 = inlined_call_operand.hbm [shape: f32[2,384], index: 0, kind: input, shape index: {}]   ;;  %s379_s1 = inlined_call_operand.vmem [shape: f32[1,384], index: 1, kind: input, shape index: {}]   ;;  %s380_s2 = inlined_call_operand.vmem [shape: f32[1,384], index: 2, kind: input, shape index: {}]   ;;  %s381_s3 = inlined_call_operand.hbm [shape: bf16[2,384], index: 3, kind: output, shape index: {}]  }
   0x1   :  { %9 = vsyncpa [#allocation4], 0  ;;  %s297_s12 = smov [#allocation2]   ;;  %s249_s16 = scalar_lea.hbm %s378_s0, 96 }
   0x2   :  { %s16_s13 = sshll.u32 %s297_s12, 4  ;;  %p250_p0 = scmp.ne.s32.totalorder %s378_s0, %s249_s16  ;;  %s17_s13 = int_to_ptr.vmem [resolvable:$true] %s16_s13 }
   0x3   :  { %p253_p1 = scmp.lt.u32.totalorder %s249_s16, %s378_s0 }
   0x5   :  { %p255_p2 = pnand %p253_p1, %p250_p0 }
   0x7   :  { %258 = shalt.err (!%p255_p2)
}
   0x8   :  { %s259_s21 = scalar_lea.vmem %s17_s13, 96  ;;  %p264_p4 = scmp.lt.s32.totalorder %s17_s13, %s17_s13 }
   0x9   :  { %p260_p3 = scmp.ne.s32.totalorder %s17_s13, %s259_s21  ;;  %p265_p5 = scmp.lt.s32.totalorder %s259_s21, %s259_s21 }
   0xb   :  { %p266_p6 = por %p265_p5, %p264_p4 }
   0xd   :  { %p267_p7 = pnand %p266_p6, %p260_p3 }
   0xf   :  { %270 = shalt.err (!%p267_p7)
}
  0x10   :  { %19 = dma.hbm_to_vmem [thread:$0]  %s378_s0, 96, %s17_s13, [#allocation3]  }
  0x11   :  { %293 = dma.done.wait [#allocation3], 96  }
  0x12   :  { %294 = vsyncadd [#allocation3], 4294967200  ;;  %v33_v0 = vlaneseq  ;;  %v298_v1 = vmov 1983009808   ;;  %v27_v6 = vld [vmem:[#allocation2] sm:$0x3f] }
  0x13   :  { %v31_v2 = vunpack.c.l.s4 %v298_v1  ;;  %vm48_vm0 = vcmask 1041408   ;;  %v29_v7 = vcombine.high %v27_v6, %v27_v6  ;;  %v299_v16 = vmov 269488144   ;;  %v109_v38 = vld [vmem:[%s379_s1] sm:$0x7]  ;;  %s301_s1 = smov [#allocation5]  }
  0x14   :  { %v334_v3 = vshrl.u32 %v33_v0, 7  ;;  %v60_v17 = vunpack.c.l.s4 %v299_v16  ;;  %v141_v40 = vld [vmem:[%s380_s2] sm:$0x7]  ;;  %v300_v59 = vmov 1966171168   ;;  %s230_s2 = sshll.u32 %s301_s1, 4  ;;  %s231_s2 = int_to_ptr.vmem [resolvable:$true] %s230_s2 }
  0x15   :  { %v32_v4 = vunpack.c.0.s8 %v31_v2  ;;  %v201_v60 = vunpack.c.l.s4 %v300_v59  ;;  %s271_s27 = scalar_lea.vmem %s231_s2, 48  ;;  %s275_s28 = scalar_lea.vmem %s231_s2, 64 }
  0x16   :  { %v61_v18 = vunpack.c.0.s8 %v60_v17  ;;  %v113_v35 = vsub.s32 0, %v334_v3  ;;  %v117_v36 = vsub.s32 1, %v334_v3  ;;  %v121_v43 = vsub.s32 2, %v334_v3  ;;  %p272_p8 = scmp.ne.s32.totalorder %s231_s2, %s271_s27  ;;  %p276_p9 = scmp.lt.s32.totalorder %s231_s2, %s231_s2 }
  0x17   :  { %v337_v5 = vsub.s32 %v32_v4, %v334_v3  ;;  %v202_v63 = vunpack.c.0.s8 %v201_v60  ;;  %p277_p10 = scmp.lt.s32.totalorder %s275_s28, %s271_s27 }
  0x18   :  { %v64_v19 = vsub.s32 %v61_v18, %v334_v3  ;;  %v114_v41 = vrot.slane %v109_v38, %v113_v35  ;;  %v118_v42 = vrot.slane %v109_v38, %v117_v36  ;;  %v146_v44 = vrot.slane %v141_v40, %v113_v35 }
  0x19   :  { %v36_v8 = vrot.slane %v27_v6, %v337_v5  ;;  %v43_v9 = vrot.slane %v29_v7, %v337_v5  ;;  %v150_v45 = vrot.slane %v141_v40, %v117_v36  ;;  %v122_v46 = vrot.slane %v109_v38, %v121_v43  ;;  %p278_p11 = por %p277_p10, %p276_p9 }
  0x1a   :  { %v123_v47 = vcombine.low %v114_v41, %v118_v42  ;;  %v154_v48 = vrot.slane %v141_v40, %v121_v43 }
  0x1b   :  { %v44_v10 = vcombine.high %v36_v8, %v36_v8  ;;  %v49_v11 = vsel %vm48_vm0, %v36_v8, 0.0  ;;  %v52_v13 = vsel %vm48_vm0, %v43_v9, 0.0  ;;  %v155_v49 = vcombine.low %v146_v44, %v150_v45  ;;  %p279_p12 = pnand %p278_p11, %p272_p8 }
  0x1c   :  { %v130_v50 = vrot.slane %v123_v47, %v337_v5  ;;  %v137_v51 = vrot.slane %v122_v46, %v337_v5  ;;  %v169_v53 = vrot.slane %v154_v48, %v337_v5 }
  0x1d   :  { %v50_v12 = vsel %vm48_vm0, %v44_v10, 0.0  ;;  %v162_v52 = vrot.slane %v155_v49, %v337_v5 }
  0x1e   :  { %v51_v14 = vadd.f32 %v50_v12, %v49_v11  ;;  %v138_v56 = vcombine.low %v130_v50, %v137_v51 }
  0x1f   :  { %v170_v58 = vcombine.low %v162_v52, %v169_v53 }
  0x20   :  { %v53_v15 = vadd.f32 %v52_v13, %v51_v14 }
  0x22   :  { %54 = vadd.xlane.f32.xlu0 %v53_v15 }
  0xaf   :  { %v55_v20 = vpop.xlane.xlu0 %54 }
  0xb0   :  { %v57_v21 = vmul.f32 0.0026041667, %v55_v20 }
  0xb2   :  { %v65_v22 = vrot.slane %v57_v21, %v64_v19 }
  0xb4   :  { %v67_v23 = vsub.f32 %v27_v6, %v65_v22  ;;  %v205_v6 = vsub.s32 %v202_v63, %v334_v3 }
  0xb6   :  { %v68_v24 = vmul.f32 %v67_v23, %v67_v23 }
  0xb8   :  { %v70_v25 = vcombine.high %v68_v24, %v68_v24  ;;  %v77_v26 = vrot.slane %v68_v24, %v337_v5 }
  0xba   :  { %v84_v27 = vrot.slane %v70_v25, %v337_v5  ;;  %v85_v28 = vcombine.high %v77_v26, %v77_v26  ;;  %v89_v29 = vsel %vm48_vm0, %v77_v26, 0.0 }
  0xbc   :  { %v90_v30 = vsel %vm48_vm0, %v85_v28, 0.0  ;;  %v92_v32 = vsel %vm48_vm0, %v84_v27, 0.0 }
  0xbd   :  { %v91_v31 = vadd.f32 %v90_v30, %v89_v29 }
  0xbf   :  { %v93_v33 = vadd.f32 %v92_v32, %v91_v31 }
  0xc1   :  { %94 = vadd.xlane.f32.xlu0 %v93_v33 }
 0x14e   :  { %v95_v34 = vpop.xlane.xlu0 %94 }
 0x14f   :  { %v96_v37 = vmul.f32 0.0026041667, %v95_v34 }
 0x151   :  { %v97_v39 = vadd.f32 1e-05, %v96_v37 }
 0x153   :  { %247 = vrsqrt.f32 %v97_v39 }
 0x15d   :  { %v248_v54 = vpop.eup %247 }
 0x15e   :  { %v106_v55 = vrot.slane %v248_v54, %v64_v19 }
 0x160   :  { %v108_v57 = vmul.f32 %v106_v55, %v67_v23 }
 0x162   :  { %v140_v61 = vmul.f32 %v138_v56, %v108_v57 }
 0x164   :  { %v172_v62 = vadd.f32 %v170_v58, %v140_v61 }
 0x166   :  { %v174_v0 = vcombine.high %v172_v62, %v172_v62  ;;  %v181_v1 = vrot.slane %v172_v62, %v337_v5 }
 0x168   :  { %v188_v2 = vrot.slane %v174_v0, %v337_v5  ;;  %v189_v4 = vcombine.high %v181_v1, %v181_v1 }
 0x16a   :  { %v195_v7 = vpack.c.bf16 %v188_v2, %v188_v2  ;;  %v239_v8 = vpack.c.bf16 %v189_v4, %v181_v1 }
 0x16c   :  { %v206_v9 = vrot.slane %v239_v8, %v205_v6  ;;  %v213_v10 = vrot.slane %v195_v7, %v205_v6 }
 0x16e   :  { %v214_v11 = vcombine.low %v206_v9, %v213_v10 }
 0x170   :  { %240 = vst.sshfl [vmem:[#allocation5] sm:$0x15 pattern:$0x73625140] %v214_v11 }
 0x171   :  { %282 = shalt.err (!%p279_p12)
}
 0x172   :  { %s283_s4 = scalar_lea.hbm %s381_s3, 48 }
 0x173   :  { %p284_p13 = scmp.ne.s32.totalorder %s381_s3, %s283_s4  ;;  %p287_p0 = scmp.lt.u32.totalorder %s283_s4, %s381_s3 }
 0x175   :  { %p289_p1 = pnand %p287_p0, %p284_p13 }
 0x177   :  { %292 = shalt.err (!%p289_p1)
}
 0x178   :  { %233 = dma.vmem_to_hbm [thread:$0]  %s231_s2, 48, %s381_s3, [#allocation4]  }
 0x179   :  { %295 = dma.done.wait [#allocation4], 48  }
 0x17a   :  { %296 = vsyncadd [#allocation4], 4294967248 }
 0x17b   :  { %237 = vsyncpa [#allocation3], 1 }
 0x17c   :  { %238 = vsyncpa [#allocation4], 1 }

</bundles_post_ra>
